<compile_context>
chip_gen: v7x
topology: tpu7x:2x2x1
jax: 0.10.0
libtpu: 0.0.40
codegen_flags: <defaults>
</compile_context>

<pallas_src>
import jax
import jax.numpy as jnp
from jax import lax
from jax.experimental import pallas as pl
from jax.experimental.pallas import tpu as pltpu

LANES = 128
SUBLANES = 8


def _round_up(x, n):
    return ((x + n - 1) // n) * n


def _detect_num_cores():
    """Best-effort TensorCores-per-chip query (v7x / megacore: 2; v5e/v6e: 1)."""
    try:
        info = pltpu.get_tpu_info()
        for attr in ("num_cores", "num_tensorcores", "tensorcores_per_chip",
                     "cores_per_chip", "core_count"):
            v = getattr(info, attr, None)
            if v:
                return max(1, min(int(v), 4))
    except Exception:
        pass
    return 1


def recon_sample_forward(recon, ground_truth, *, tile_rows=4096, num_cores=None):
    """loss(sigmoid(recon), ground_truth) with MSE(mean) loss, via Pallas on TPU.

    Matches the PyTorch module with loss_function = F.mse_loss:
        loss = mean((sigmoid(recon) - ground_truth) ** 2)
    """
    assert recon.shape == ground_truth.shape
    total = int(recon.size)
    if num_cores is None:
        num_cores = _detect_num_cores()

    # Flatten row-major into a lane-dense (M, 128) view in the NATIVE dtype
    # (no wrapper-side astype -> no extra HBM pass; kernel casts to f32 on VPU).
    r_flat = recon.reshape(-1)
    g_flat = ground_truth.reshape(-1)

    # Rare ragged case: total not a multiple of 128 lanes. Pad minimally so the
    # 2-D lane-dense view exists; padded elements are masked inside the kernel.
    if total % LANES != 0:
        pad = LANES - (total % LANES)
        r_flat = jnp.pad(r_flat, (0, pad))
        g_flat = jnp.pad(g_flat, (0, pad))
    m_rows = r_flat.size // LANES

    # Tile: full array if small, else a large multiple-of-32 row tile
    # (32 keeps the sublane packing legal for f32 / bf16 / int8 inputs alike).
    if m_rows <= tile_rows:
        tm = m_rows
    else:
        tm = _round_up(tile_rows, 32)
    num_blocks = pl.cdiv(m_rows, tm)
    eff_cores = max(1, min(num_cores, num_blocks))
    steps_per_core = pl.cdiv(num_blocks, eff_cores)

    # Fold each (tm, 128) squared-error tile down to (acc_rows, 128) with pure
    # VPU adds — shrinks the accumulator scratch and the partials writeback.
    acc_rows = 512 if tm % 512 == 0 else tm
    folds = tm // acc_rows
    tile_elems = tm * LANES

    r2 = r_flat.reshape(m_rows, LANES)
    g2 = g_flat.reshape(m_rows, LANES)

    def _fold(x):
        out = x[0:acc_rows, :]
        for f in range(1, folds):
            out = out + x[f * acc_rows:(f + 1) * acc_rows, :]
        return out

    def kernel(recon_ref, gt_ref, partial_ref, acc_ref):
        c = pl.program_id(0)
        s = pl.program_id(1)

        @pl.when(s == 0)
        def _init():
            acc_ref[...] = jnp.zeros_like(acc_ref)

        x = recon_ref[...].astype(jnp.float32)
        g = gt_ref[...].astype(jnp.float32)
        sig = 0.5 * (jnp.tanh(0.5 * x) + 1.0)          # == sigmoid(x), 1 EUP op
        d = sig - g
        sq = d * d

        # Nominal (unclamped) block index. Blocks extending past `total`
        # (ragged tail, lane padding, or clamped duplicate blocks) get masked;
        # all other steps take the unmasked fast path.
        blk = c * steps_per_core + s
        base = blk * tile_elems
        is_full = base + tile_elems <= total

        @pl.when(is_full)
        def _acc_full():
            acc_ref[...] += _fold(sq)

        @pl.when(jnp.logical_not(is_full))
        def _acc_masked():
            row = lax.broadcasted_iota(jnp.int32, (tm, LANES), 0)
            lane = lax.broadcasted_iota(jnp.int32, (tm, LANES), 1)
            idx = base + row * LANES + lane
            acc_ref[...] += _fold(jnp.where(idx < total, sq, 0.0))

        @pl.when(s == steps_per_core - 1)
        def _finalize():
            partial_ref[...] = acc_ref[...]

    def in_map(c, s):
        blk = c * steps_per_core + s
        # Clamp the (at most eff_cores-1) overshoot blocks back in bounds;
        # the in-kernel mask zeroes their contribution.
        return (jnp.minimum(blk, num_blocks - 1), 0)

    # VMEM: 2 inputs x 2 pipeline buffers + double-buffered output + scratch,
    # with generous headroom for elementwise intermediates; <= 48 MiB is safe
    # on every generation (v7x physical VMEM is 64 MiB per TensorCore).
    in_bytes = 2 * tm * LANES * (r2.dtype.itemsize + g2.dtype.itemsize)
    out_bytes = 3 * acc_rows * LANES * 4
    vmem_bytes = int(min(max(3 * (in_bytes + out_bytes), 24 << 20), 48 << 20))

    partials = pl.pallas_call(
        kernel,
        out_shape=jax.ShapeDtypeStruct((eff_cores * acc_rows, LANES), jnp.float32),
        grid_spec=pltpu.PrefetchScalarGridSpec(
            num_scalar_prefetch=0,
            grid=(eff_cores, steps_per_core),
            in_specs=[
                pl.BlockSpec((tm, LANES), in_map),
                pl.BlockSpec((tm, LANES), in_map),
            ],
            out_specs=pl.BlockSpec((acc_rows, LANES), lambda c, s: (c, 0)),
            scratch_shapes=[pltpu.VMEM((acc_rows, LANES), jnp.float32)],
        ),
        compiler_params=pltpu.CompilerParams(
            dimension_semantics=("parallel", "arbitrary"),
            vmem_limit_bytes=vmem_bytes,
        ),
    )(r2, g2)

    # Tiny final reduce + mean normalization (exact 1/N computed in Python).
    return jnp.sum(partials) * jnp.float32(1.0 / total)


if __name__ == "__main__":
    # Small shapes consistent with the module: ground_truth is an image batch.
    B, C, H, W = 2, 4, 16, 16
    key = jax.random.PRNGKey(0)
    k_gt, k_recon = jax.random.split(key)

    # Deterministic "parameter" init (torch.randn equivalent) and target.
    ground_truth = jax.random.uniform(k_gt, (B, C, H, W), dtype=jnp.float32)
    recon_param = jax.random.normal(k_recon, (B, C, H, W), dtype=jnp.float32)

    loss = recon_sample_forward(recon_param, ground_truth)
    loss = jax.block_until_ready(loss)

    # Pure-JAX reference check.
    ref = jnp.mean((jax.nn.sigmoid(recon_param) - ground_truth) ** 2)
    assert jnp.allclose(loss, ref, rtol=1e-5, atol=1e-5), (loss, ref)

    print("KERNEL_OK")
</pallas_src>

<mosaic_0001>
module attributes {stable_mosaic.version = 11 : i64} {
  func.func @kernel(%arg0: i32, %arg1: i32, %arg2: memref<16x128xf32, #tpu.memory_space<vmem>>, %arg3: memref<16x128xf32, #tpu.memory_space<vmem>>, %arg4: memref<16x128xf32, #tpu.memory_space<vmem>>, %arg5: memref<16x128xf32, #tpu.memory_space<vmem>>) attributes {dimension_semantics = [#tpu.dimension_semantics<parallel>, #tpu.dimension_semantics<arbitrary>], iteration_bounds = array<i64: 1, 1>, scalar_prefetch = 0 : i64, scratch_operands = 1 : i64, tpu.core_type = #tpu.core_type<tc>, window_params = [{transform_indices = @transform_0, window_bounds = array<i64: 16, 128>}, {transform_indices = @transform_1, window_bounds = array<i64: 16, 128>}, {transform_indices = @transform_2, window_bounds = array<i64: 16, 128>}]} {
    %c0_i32 = arith.constant 0 : i32
    %0 = arith.cmpi eq, %arg1, %c0_i32 : i32
    %1 = arith.extui %0 : i1 to i32
    %c0_i32_0 = arith.constant 0 : i32
    %2 = arith.cmpi ne, %1, %c0_i32_0 : i32
    scf.if %2 {
      %cst_12 = arith.constant 0.000000e+00 : f32
      %27 = vector.broadcast %cst_12 : f32 to vector<16x128xf32>
      %c0_13 = arith.constant 0 : index
      %c0_14 = arith.constant 0 : index
      %28 = vector.load %arg5[%c0_13, %c0_14] : memref<16x128xf32, #tpu.memory_space<vmem>>, vector<16x128xf32>
      tpu.vector_store %arg5[%c0_13, %c0_14], %27 {strides = array<i32>} : memref<16x128xf32, #tpu.memory_space<vmem>>, vector<16x128xf32>,
    } else {
    }
    %c0 = arith.constant 0 : index
    %c0_1 = arith.constant 0 : index
    %3 = vector.load %arg2[%c0, %c0_1] : memref<16x128xf32, #tpu.memory_space<vmem>>, vector<16x128xf32>
    %c0_2 = arith.constant 0 : index
    %c0_3 = arith.constant 0 : index
    %4 = vector.load %arg3[%c0_2, %c0_3] : memref<16x128xf32, #tpu.memory_space<vmem>>, vector<16x128xf32>
    %cst = arith.constant 5.000000e-01 : f32
    %5 = vector.broadcast %cst : f32 to vector<16x128xf32>
    %6 = arith.mulf %5, %3 : vector<16x128xf32>
    %7 = math.tanh %6 : vector<16x128xf32>
    %cst_4 = arith.constant 1.000000e+00 : f32
    %8 = vector.broadcast %cst_4 : f32 to vector<16x128xf32>
    %9 = arith.addf %7, %8 : vector<16x128xf32>
    %cst_5 = arith.constant 5.000000e-01 : f32
    %10 = vector.broadcast %cst_5 : f32 to vector<16x128xf32>
    %11 = arith.mulf %10, %9 : vector<16x128xf32>
    %12 = arith.subf %11, %4 : vector<16x128xf32>
    %13 = arith.mulf %12, %12 : vector<16x128xf32>
    %c1_i32 = arith.constant 1 : i32
    %14 = arith.muli %arg0, %c1_i32 : i32
    %15 = arith.addi %14, %arg1 : i32
    %c2048_i32 = arith.constant 2048 : i32
    %16 = arith.muli %15, %c2048_i32 : i32
    %c2048_i32_6 = arith.constant 2048 : i32
    %17 = arith.addi %16, %c2048_i32_6 : i32
    %c2048_i32_7 = arith.constant 2048 : i32
    %18 = arith.cmpi sle, %17, %c2048_i32_7 : i32
    %19 = arith.extui %18 : i1 to i32
    %c0_i32_8 = arith.constant 0 : i32
    %20 = arith.cmpi ne, %19, %c0_i32_8 : i32
    scf.if %20 {
      %c0_12 = arith.constant 0 : index
      %c0_13 = arith.constant 0 : index
      %27 = vector.load %arg5[%c0_12, %c0_13] : memref<16x128xf32, #tpu.memory_space<vmem>>, vector<16x128xf32>
      %28 = arith.addf %27, %13 : vector<16x128xf32>
      %c0_14 = arith.constant 0 : index
      %c0_15 = arith.constant 0 : index
      %29 = vector.load %arg5[%c0_14, %c0_15] : memref<16x128xf32, #tpu.memory_space<vmem>>, vector<16x128xf32>
      tpu.vector_store %arg5[%c0_14, %c0_15], %28 {strides = array<i32>} : memref<16x128xf32, #tpu.memory_space<vmem>>, vector<16x128xf32>,
    } else {
    }
    %true = arith.constant true
    %21 = arith.xori %18, %true : i1
    %22 = arith.extui %21 : i1 to i32
    %c0_i32_9 = arith.constant 0 : i32
    %23 = arith.cmpi ne, %22, %c0_i32_9 : i32
    scf.if %23 {
      %27 = tpu.iota {dimensions = array<i32: 0>} : vector<16x128xi32>
      %28 = tpu.iota {dimensions = array<i32: 1>} : vector<16x128xi32>
      %c128_i32 = arith.constant 128 : i32
      %29 = vector.broadcast %c128_i32 : i32 to vector<16x128xi32>
      %30 = arith.muli %27, %29 : vector<16x128xi32>
      %31 = vector.broadcast %16 : i32 to vector<16x128xi32>
      %32 = arith.addi %31, %30 : vector<16x128xi32>
      %33 = arith.addi %32, %28 : vector<16x128xi32>
      %c0_12 = arith.constant 0 : index
      %c0_13 = arith.constant 0 : index
      %34 = vector.load %arg5[%c0_12, %c0_13] : memref<16x128xf32, #tpu.memory_space<vmem>>, vector<16x128xf32>
      %c2048_i32_14 = arith.constant 2048 : i32
      %35 = vector.broadcast %c2048_i32_14 : i32 to vector<16x128xi32>
      %36 = arith.cmpi slt, %33, %35 : vector<16x128xi32>
      %cst_15 = arith.constant 0.000000e+00 : f32
      %37 = vector.broadcast %cst_15 : f32 to vector<16x128xf32>
      %38 = arith.select %36, %13, %37 : vector<16x128xi1>, vector<16x128xf32>
      %39 = arith.addf %34, %38 : vector<16x128xf32>
      %c0_16 = arith.constant 0 : index
      %c0_17 = arith.constant 0 : index
      %40 = vector.load %arg5[%c0_16, %c0_17] : memref<16x128xf32, #tpu.memory_space<vmem>>, vector<16x128xf32>
      tpu.vector_store %arg5[%c0_16, %c0_17], %39 {strides = array<i32>} : memref<16x128xf32, #tpu.memory_space<vmem>>, vector<16x128xf32>,
    } else {
    }
    %c0_i32_10 = arith.constant 0 : i32
    %24 = arith.cmpi eq, %arg1, %c0_i32_10 : i32
    %25 = arith.extui %24 : i1 to i32
    %c0_i32_11 = arith.constant 0 : i32
    %26 = arith.cmpi ne, %25, %c0_i32_11 : i32
    scf.if %26 {
      %c0_12 = arith.constant 0 : index
      %c0_13 = arith.constant 0 : index
      %27 = vector.load %arg5[%c0_12, %c0_13] : memref<16x128xf32, #tpu.memory_space<vmem>>, vector<16x128xf32>
      %c0_14 = arith.constant 0 : index
      %c0_15 = arith.constant 0 : index
      %28 = vector.load %arg4[%c0_14, %c0_15] : memref<16x128xf32, #tpu.memory_space<vmem>>, vector<16x128xf32>
      tpu.vector_store %arg4[%c0_14, %c0_15], %27 {strides = array<i32>} : memref<16x128xf32, #tpu.memory_space<vmem>>, vector<16x128xf32>,
    } else {
    }
    return
  }
  func.func @transform_0(%arg0: i32, %arg1: i32) -> (i32, i32) {
    %c1_i32 = arith.constant 1 : i32
    %0 = arith.muli %arg0, %c1_i32 : i32
    %1 = arith.addi %0, %arg1 : i32
    %c0_i32 = arith.constant 0 : i32
    %2 = arith.minsi %1, %c0_i32 : i32
    %c0_i32_0 = arith.constant 0 : i32
    %c0_i32_1 = arith.constant 0 : i32
    return %2, %c0_i32_0 : i32, i32
  }
  func.func @transform_1(%arg0: i32, %arg1: i32) -> (i32, i32) {
    %c1_i32 = arith.constant 1 : i32
    %0 = arith.muli %arg0, %c1_i32 : i32
    %1 = arith.addi %0, %arg1 : i32
    %c0_i32 = arith.constant 0 : i32
    %2 = arith.minsi %1, %c0_i32 : i32
    %c0_i32_0 = arith.constant 0 : i32
    %c0_i32_1 = arith.constant 0 : i32
    return %2, %c0_i32_0 : i32, i32
  }
  func.func @transform_2(%arg0: i32, %arg1: i32) -> (i32, i32) {
    %c0_i32 = arith.constant 0 : i32
    %c0_i32_0 = arith.constant 0 : i32
    return %arg0, %c0_i32 : i32, i32
  }
}

</mosaic_0001>

<bundles_post_ra>
// kernel: tpu_custom_call.1
= control target key start
LH: loop header
LB: loop body
LE: loop exit
PB: predicated region body
PF: predicated region fallthrough
CT: control target
= control target key end

     0   :  { %7 = vsyncpa [#allocation4], 0  ;;  %s296_s0 = inlined_call_operand.hbm [shape: f32[16,128], index: 0, kind: input, shape index: {}]   ;;  %s297_s1 = inlined_call_operand.hbm [shape: f32[16,128], index: 1, kind: input, shape index: {}]   ;;  %s298_s2 = inlined_call_operand.hbm [shape: f32[16,128], index: 2, kind: output, shape index: {}]  }
   0x1   :  { %8 = vsyncpa [#allocation7], 0 }
   0x2   :  { %9 = vsyncpa [#allocation5], 0  ;;  %s231_s9 = smov [#allocation3]   ;;  %s159_s13 = scalar_lea.hbm %s296_s0, 256 }
   0x3   :  { %s21_s10 = sshll.u32 %s231_s9, 4  ;;  %p160_p0 = scmp.ne.s32.totalorder %s296_s0, %s159_s13  ;;  %s22_s10 = int_to_ptr.vmem [resolvable:$true] %s21_s10 }
   0x4   :  { %p163_p1 = scmp.lt.u32.totalorder %s159_s13, %s296_s0 }
   0x6   :  { %p165_p2 = pnand %p163_p1, %p160_p0 }
   0x8   :  { %168 = shalt.err (!%p165_p2)
}
   0x9   :  { %s169_s18 = scalar_lea.vmem %s22_s10, 256  ;;  %p174_p4 = scmp.lt.s32.totalorder %s22_s10, %s22_s10 }
   0xa   :  { %p170_p3 = scmp.ne.s32.totalorder %s22_s10, %s169_s18  ;;  %p175_p5 = scmp.lt.s32.totalorder %s169_s18, %s169_s18 }
   0xc   :  { %p176_p6 = por %p175_p5, %p174_p4 }
   0xe   :  { %p177_p7 = pnand %p176_p6, %p170_p3 }
  0x10   :  { %180 = shalt.err (!%p177_p7)
}
  0x11   :  { %s232_s19 = smov 128   ;;  %s233_s20 = smov 8  }
  0x12   :  { %27 = dma.hbm_to_vmem [thread:$0]  %s296_s0, 256, %s22_s10, [#allocation4], %s232_s19, %s232_s19, %s233_s20  }
  0x13   :  { %s234_s23 = smov [#allocation6]   ;;  %s181_s27 = scalar_lea.hbm %s297_s1, 256 }
  0x14   :  { %s39_s24 = sshll.u32 %s234_s23, 4  ;;  %p182_p8 = scmp.ne.s32.totalorder %s297_s1, %s181_s27  ;;  %s40_s24 = int_to_ptr.vmem [resolvable:$true] %s39_s24 }
  0x15   :  { %p185_p9 = scmp.lt.u32.totalorder %s181_s27, %s297_s1 }
  0x17   :  { %p187_p10 = pnand %p185_p9, %p182_p8 }
  0x19   :  { %190 = shalt.err (!%p187_p10)
}
  0x1a   :  { %s191_s4 = scalar_lea.vmem %s40_s24, 256  ;;  %p196_p12 = scmp.lt.s32.totalorder %s40_s24, %s40_s24 }
  0x1b   :  { %p192_p11 = scmp.ne.s32.totalorder %s40_s24, %s191_s4  ;;  %p197_p13 = scmp.lt.s32.totalorder %s191_s4, %s191_s4 }
  0x1d   :  { %p198_p0 = por %p197_p13, %p196_p12 }
  0x1f   :  { %p199_p1 = pnand %p198_p0, %p192_p11 }
  0x21   :  { %202 = shalt.err (!%p199_p1)
}
  0x22   :  { %45 = dma.hbm_to_vmem [thread:$0]  %s297_s1, 256, %s40_s24, [#allocation7], %s232_s19, %s232_s19, %s233_s20  }
  0x23   :  { %225 = dma.done.wait [#allocation4], 256  }
  0x24   :  { %226 = vsyncadd [#allocation4], 4294967040 }
  0x25   :  { %227 = dma.done.wait [#allocation7], 256  }
  0x26   :  { %228 = vsyncadd [#allocation7], 4294967040  ;;  %v66_v0 = vld [vmem:[#allocation3] sm:$0xff]  ;;  %v67_v1 = vld [vmem:[#allocation3 + $0x8] sm:$0xff]  ;;  %s235_s1 = smov [#allocation8]  }
  0x27   :  { %v70_v2 = vmul.f32 0.5, %v66_v0  ;;  %v71_v3 = vmul.f32 0.5, %v67_v1  ;;  %v68_v7 = vld [vmem:[#allocation6] sm:$0xff]  ;;  %v69_v10 = vld [vmem:[#allocation6 + $0x8] sm:$0xff]  ;;  %s133_s6 = sshll.u32 %s235_s1, 4  ;;  %s134_s6 = int_to_ptr.vmem [resolvable:$true] %s133_s6 }
  0x28   :  { %s203_s7 = scalar_lea.vmem %s134_s6, 256  ;;  %p208_p3 = scmp.lt.s32.totalorder %s134_s6, %s134_s6 }
  0x29   :  { %155 = vtanh.f32 %v70_v2  ;;  %p204_p2 = scmp.ne.s32.totalorder %s134_s6, %s203_s7  ;;  %p209_p4 = scmp.lt.s32.totalorder %s203_s7, %s203_s7 }
  0x2a   :  { %157 = vtanh.f32 %v71_v3 }
  0x2b   :  { %p210_p5 = por %p209_p4, %p208_p3 }
  0x2d   :  { %p211_p6 = pnand %p210_p5, %p204_p2 }
  0x33   :  { %v156_v4 = vpop.eup %155 }
  0x34   :  { %v158_v5 = vpop.eup %157  ;;  %v74_v6 = vadd.f32 1.0, %v156_v4 }
  0x35   :  { %v75_v8 = vadd.f32 1.0, %v158_v5 }
  0x36   :  { %v76_v9 = vmul.f32 0.5, %v74_v6 }
  0x37   :  { %v77_v11 = vmul.f32 0.5, %v75_v8 }
  0x38   :  { %v78_v12 = vsub.f32 %v76_v9, %v68_v7 }
  0x39   :  { %v79_v13 = vsub.f32 %v77_v11, %v69_v10 }
  0x3a   :  { %v80_v14 = vmul.f32 %v78_v12, %v78_v12 }
  0x3b   :  { %v81_v15 = vmul.f32 %v79_v13, %v79_v13 }
  0x3c   :  { %126 = vst [vmem:[#allocation8] sm:$0xff] %v80_v14 }
  0x3d   :  { %127 = vst [vmem:[#allocation8 + $0x8] sm:$0xff] %v81_v15 }
  0x3e   :  { %214 = shalt.err (!%p211_p6)
}
  0x3f   :  { %s215_s10 = scalar_lea.hbm %s298_s2, 256 }
  0x40   :  { %p216_p7 = scmp.ne.s32.totalorder %s298_s2, %s215_s10  ;;  %p219_p8 = scmp.lt.u32.totalorder %s215_s10, %s298_s2 }
  0x42   :  { %p221_p9 = pnand %p219_p8, %p216_p7 }
  0x44   :  { %224 = shalt.err (!%p221_p9)
}
  0x45   :  { %139 = dma.vmem_to_hbm [thread:$0]  %s134_s6, 256, %s298_s2, [#allocation5], %s232_s19, %s232_s19, %s233_s20  }
  0x46   :  { %229 = dma.done.wait [#allocation5], 256  }
  0x47   :  { %230 = vsyncadd [#allocation5], 4294967040 }
  0x48   :  { %143 = vsyncpa [#allocation4], 1 }
  0x49   :  { %144 = vsyncpa [#allocation7], 1 }
  0x4a   :  { %145 = vsyncpa [#allocation5], 1 }

</bundles_post_ra>
